<compile_context>
chip_gen: v7x
topology: tpu7x:2x2x1
jax: 0.10.0
libtpu: 0.0.40
codegen_flags: <defaults>
</compile_context>

<pallas_src>
import math
import functools

import jax
import jax.numpy as jnp
from jax.experimental import pallas as pl
from jax.experimental.pallas import tpu as pltpu


# ---------------------------------------------------------------------------
# Pallas kernel 1: 1x1 conv (channel matmul) + GroupNorm(32, hidden_dim)
# Layout: (Cout, HW) inside the kernel — NCHW-native, lane axis = HW (multiple
# of 128). Batch is a static in-kernel loop (single kernel invocation).
# ---------------------------------------------------------------------------
def _input_proj_kernel(x_ref, w_ref, b_ref, gamma_ref, beta_ref, pavg_ref,
                       o_ref, *, eps):
    w = w_ref[...]                                                   # (Cout, Cin) bf16
    bias = b_ref[...]                                                # (Cout, 1) f32
    gamma = gamma_ref[...]                                           # (Cout, 1) f32
    beta = beta_ref[...]                                             # (Cout, 1) f32
    pavg = pavg_ref[...]                                             # (Cout, Cout) f32

    for bi in range(x_ref.shape[0]):                                 # static loop over B
        # 1x1 conv == per-pixel channel matmul (bf16 MXU feed, f32 accumulate)
        y = jnp.dot(w, x_ref[bi], preferred_element_type=jnp.float32) + bias  # (Cout, HW)

        # GroupNorm: HW-first reductions, then the tiny group-average matmul.
        mu_c = jnp.mean(y, axis=1, keepdims=True)                    # (Cout, 1)
        mu_g = jnp.dot(pavg, mu_c, preferred_element_type=jnp.float32)   # (Cout, 1)
        centered = y - mu_g                                          # (Cout, HW)
        ss_c = jnp.mean(centered * centered, axis=1, keepdims=True)  # (Cout, 1)
        var_g = jnp.dot(pavg, ss_c, preferred_element_type=jnp.float32)  # (Cout, 1)

        # Fused affine: one multiply + one add on the (Cout, HW) slab.
        scale = gamma * jax.lax.rsqrt(var_g + eps)                   # (Cout, 1)
        o_ref[bi] = centered * scale + beta                          # (Cout, HW)


def input_proj_groupnorm(x_nchw, w, b, gamma, beta, *, num_groups=32, eps=1e-5):
    """1x1 Conv2d(Cin->Cout) + GroupNorm(num_groups, Cout). Input NCHW, output NCHW."""
    B, Cin, H, W = x_nchw.shape
    Cout = w.shape[0]
    HW = H * W
    cpg = Cout // num_groups

    x = x_nchw.reshape(B, Cin, HW).astype(jnp.bfloat16)              # free NCHW reshape
    wb = w.astype(jnp.bfloat16)
    b2 = b.reshape(Cout, 1)
    g2 = gamma.reshape(Cout, 1)
    be2 = beta.reshape(Cout, 1)

    ch = jnp.arange(Cout)
    pavg = (ch[:, None] // cpg == ch[None, :] // cpg).astype(jnp.float32) / float(cpg)

    ce = pl.CostEstimate(
        flops=2 * B * Cout * Cin * HW + 4 * B * Cout * Cout + 8 * B * Cout * HW,
        transcendentals=B * Cout,
        bytes_accessed=(x.size * 2 + wb.size * 2
                        + (b2.size + g2.size + be2.size + pavg.size) * 4
                        + B * Cout * HW * 4),
    )

    kernel = functools.partial(_input_proj_kernel, eps=eps)
    out = pl.pallas_call(
        kernel,
        out_shape=jax.ShapeDtypeStruct((B, Cout, HW), jnp.float32),
        cost_estimate=ce,
    )(x, wb, b2, g2, be2, pavg)

    return out.reshape(B, Cout, H, W)                                # already NCHW


# ---------------------------------------------------------------------------
# Pallas kernel 2: fused pose heads for ALL decoder layers in one invocation.
#   Hidden states are concatenated along features to (M, L*D); the per-layer
#   translation (D->D->D->3) and rotation (D->D->D->6) MLPs become three
#   block-diagonal matmuls (L*D, 2*L*D), (2*L*D, 2*L*D), (2*L*D, 9*L).
#   Gram-Schmidt (rotation_6d_to_matrix) runs in-kernel per layer; output is a
#   column-grouped (M, 12*L) slab: per layer [t(3) | x(3) | y(3) | z(3)].
# ---------------------------------------------------------------------------
def _heads_kernel(h_ref, w1_ref, b1_ref, w2_ref, b2_ref, w3_ref, b3_ref, o_ref,
                  *, num_layers):
    h = h_ref[...]                                                   # (M, L*D) bf16

    a1 = jnp.maximum(
        jnp.dot(h, w1_ref[...], preferred_element_type=jnp.float32) + b1_ref[...], 0.0)
    a2 = jnp.maximum(
        jnp.dot(a1.astype(jnp.bfloat16), w2_ref[...],
                preferred_element_type=jnp.float32) + b2_ref[...], 0.0)
    z3 = (jnp.dot(a2.astype(jnp.bfloat16), w3_ref[...],
                  preferred_element_type=jnp.float32) + b3_ref[...])  # (M, 9*L)

    outs = []
    for l in range(num_layers):
        off = 9 * l
        t = z3[:, off + 0:off + 3]                                   # translation
        m1 = z3[:, off + 3:off + 6]                                  # rotation 6D, col 1
        m2 = z3[:, off + 6:off + 9]                                  # rotation 6D, col 2

        # x = normalize(m1)   (matches F.normalize clamp: v / max(||v||, 1e-12))
        inv_n1 = jax.lax.rsqrt(
            jnp.maximum(jnp.sum(m1 * m1, axis=1, keepdims=True), 1e-24))
        xv = m1 * inv_n1                                             # (M, 3)
        x0, x1, x2 = xv[:, 0:1], xv[:, 1:2], xv[:, 2:3]
        a0, b0, c0 = m2[:, 0:1], m2[:, 1:2], m2[:, 2:3]

        # z = normalize(cross(x, m2))
        zc0 = x1 * c0 - x2 * b0
        zc1 = x2 * a0 - x0 * c0
        zc2 = x0 * b0 - x1 * a0
        inv_nz = jax.lax.rsqrt(
            jnp.maximum(zc0 * zc0 + zc1 * zc1 + zc2 * zc2, 1e-24))
        zc0, zc1, zc2 = zc0 * inv_nz, zc1 * inv_nz, zc2 * inv_nz

        # y = cross(z, x)
        y0 = zc1 * x2 - zc2 * x1
        y1 = zc2 * x0 - zc0 * x2
        y2 = zc0 * x1 - zc1 * x0

        # Column-grouped output [t | x | y | z]; wrapper transposes the 3x3
        # block so columns of R are (x, y, z), matching the torch reference.
        outs.append(jnp.concatenate([t, xv, y0, y1, y2, zc0, zc1, zc2], axis=1))

    o_ref[...] = jnp.concatenate(outs, axis=1)                       # (M, 12*L)


def _block_diag(blocks):
    """Dense block-diagonal matrix from a list of 2D arrays."""
    total_cols = sum(b.shape[1] for b in blocks)
    rows, col_off = [], 0
    for b in blocks:
        left = jnp.zeros((b.shape[0], col_off), b.dtype)
        right = jnp.zeros((b.shape[0], total_cols - col_off - b.shape[1]), b.dtype)
        rows.append(jnp.concatenate([left, b, right], axis=1))
        col_off += b.shape[1]
    return jnp.concatenate(rows, axis=0)


def _fuse_head_params(t_params, r_params):
    """Fuse translation+rotation MLPs of all L layers into block-diagonal weights."""
    wt1, bt1, wt2, bt2, wt3, bt3 = t_params
    wr1, br1, wr2, br2, wr3, br3 = r_params
    L = wt1.shape[0]

    w1_b, w2_b, w3_b, b1_l, b2_l, b3_l = [], [], [], [], [], []
    for l in range(L):
        w1_b.append(jnp.concatenate([wt1[l], wr1[l]], axis=1))       # (D, 2D)
        w2_b.append(_block_diag([wt2[l], wr2[l]]))                   # (2D, 2D)
        w3_b.append(_block_diag([wt3[l], wr3[l]]))                   # (2D, 9)
        b1_l.append(jnp.concatenate([bt1[l], br1[l]], axis=1))       # (1, 2D)
        b2_l.append(jnp.concatenate([bt2[l], br2[l]], axis=1))       # (1, 2D)
        b3_l.append(jnp.concatenate([bt3[l], br3[l]], axis=1))       # (1, 9)

    W1 = _block_diag(w1_b)                                           # (L*D, 2*L*D)
    W2 = _block_diag(w2_b)                                           # (2*L*D, 2*L*D)
    W3 = _block_diag(w3_b)                                           # (2*L*D, 9*L)
    B1 = jnp.concatenate(b1_l, axis=1)                               # (1, 2*L*D)
    B2 = jnp.concatenate(b2_l, axis=1)                               # (1, 2*L*D)
    B3 = jnp.concatenate(b3_l, axis=1)                               # (1, 9*L)
    return W1, B1, W2, B2, W3, B3


def pose_heads(hs, t_params, r_params):
    """hs: (L, B, NQ, D). Returns translation (L,B,NQ,3), rotation (L,B,NQ,3,3)."""
    L, B, NQ, D = hs.shape
    M = B * NQ
    OUT = 12 * L

    W1, B1, W2, B2, W3, B3 = _fuse_head_params(t_params, r_params)
    W1b, W2b, W3b = (w.astype(jnp.bfloat16) for w in (W1, W2, W3))

    # (L, M, D) -> (M, L*D): layer-l features occupy columns l*D .. (l+1)*D.
    h_cat = jnp.transpose(hs.reshape(L, M, D), (1, 0, 2)).reshape(M, L * D)
    h_cat = h_cat.astype(jnp.bfloat16)

    ce = pl.CostEstimate(
        flops=2 * M * ((L * D) * (2 * L * D) + (2 * L * D) * (2 * L * D)
                       + (2 * L * D) * (9 * L)),
        transcendentals=2 * M * L,
        bytes_accessed=(h_cat.size * 2 + (W1.size + W2.size + W3.size) * 2
                        + (B1.size + B2.size + B3.size) * 4 + M * OUT * 4),
    )

    out = pl.pallas_call(
        functools.partial(_heads_kernel, num_layers=L),
        out_shape=jax.ShapeDtypeStruct((M, OUT), jnp.float32),
        cost_estimate=ce,
    )(h_cat, W1b, B1, W2b, B2, W3b, B3)                              # (M, 12*L)

    out = out.reshape(M, L, 12)
    t = jnp.transpose(out[..., 0:3], (1, 0, 2)).reshape(L, B, NQ, 3)
    r = out[..., 3:12].reshape(M, L, 3, 3)
    r = jnp.swapaxes(r, -1, -2)          # rows were (x,y,z) vectors -> make them columns
    r = jnp.transpose(r, (1, 0, 2, 3)).reshape(L, B, NQ, 3, 3)
    return t, r


# ---------------------------------------------------------------------------
# Glue: bbox sine embedding (plain JAX)
# ---------------------------------------------------------------------------
def bbox_embedding_sine(boxes, num_pos_feats, temperature=10000.0):
    # TODO(synk): BoundingBoxEmbeddingSine source was not provided; this is a standard
    # sine/cosine box embedding producing 4 * 2 * num_pos_feats (= hidden_dim) features.
    scale = 2.0 * math.pi
    dim_t = temperature ** (jnp.arange(num_pos_feats, dtype=jnp.float32) / num_pos_feats)
    pos = boxes[:, :, None] * scale / dim_t                          # (n, 4, P)
    emb = jnp.concatenate([jnp.sin(pos), jnp.cos(pos)], axis=-1)     # (n, 4, 2P)
    return emb.reshape(boxes.shape[0], -1)


# ---------------------------------------------------------------------------
# PoET (JAX / Pallas)
# ---------------------------------------------------------------------------
class PoETPallas:
    def __init__(self, key, *, hidden_dim=64, num_queries=8, n_classes=3,
                 num_decoder_layers=2, backbone_channels=16):
        self.hidden_dim = hidden_dim
        self.n_queries = num_queries
        self.n_classes = n_classes + 1
        self.num_dec = num_decoder_layers
        self.backbone_channels = backbone_channels
        self.t_dim, self.rot_dim = 3, 6
        D, L = hidden_dim, num_decoder_layers

        ks = jax.random.split(key, 16)

        def w(k, shape, scale=0.1):
            return scale * jax.random.normal(k, shape, jnp.float32)

        # input_proj: 1x1 conv (xavier-ish scale, bias 0) + GroupNorm (gamma=1, beta=0)
        self.conv_w = w(ks[0], (D, backbone_channels),
                        scale=math.sqrt(2.0 / (D + backbone_channels)))
        self.conv_b = jnp.zeros((D,), jnp.float32)
        self.gn_gamma = jnp.ones((D,), jnp.float32)
        self.gn_beta = jnp.zeros((D,), jnp.float32)

        # translation / rotation MLP heads, one copy per decoder layer (stacked on dim 0)
        self.t_params = (w(ks[1], (L, D, D)), w(ks[2], (L, 1, D)),
                         w(ks[3], (L, D, D)), w(ks[4], (L, 1, D)),
                         w(ks[5], (L, D, self.t_dim)), w(ks[6], (L, 1, self.t_dim)))
        self.r_params = (w(ks[7], (L, D, D)), w(ks[8], (L, 1, D)),
                         w(ks[9], (L, D, D)), w(ks[10], (L, 1, D)),
                         w(ks[11], (L, D, self.rot_dim)), w(ks[12], (L, 1, self.rot_dim)))

        # transformer stub params
        self.w_src = w(ks[13], (D, D))
        self.w_dec = w(ks[14], (L, D, D))
        self.b_dec = w(ks[15], (L, 1, D))

    def forward(self, samples, targets):
        B = samples.shape[0]
        D, NQ = self.hidden_dim, self.n_queries

        # TODO(synk): the real backbone (YOLO) is an externally injected module; replaced by
        # a deterministic 2x2 avg-pool + channel-tile feature stub in plain JAX.
        pooled = samples.reshape(B, 3, samples.shape[2] // 2, 2,
                                 samples.shape[3] // 2, 2).mean(axis=(3, 5))
        reps = self.backbone_channels // 3 + 1
        feat = jnp.tile(pooled, (1, reps, 1, 1))[:, :self.backbone_channels]  # (B,Cb,Hf,Wf)

        # bbox_mode == 'gt': build queries / boxes / classes from targets, pad to n_queries.
        pred_boxes_l, pred_classes_l, query_embeds_l, n_boxes_per_sample = [], [], [], []
        for target in targets:
            t_boxes = target['boxes'].astype(jnp.float32)
            n_boxes = t_boxes.shape[0]
            n_boxes_per_sample.append(n_boxes)
            t_classes = target['labels'].astype(jnp.int32)
            emb = bbox_embedding_sine(t_boxes, num_pos_feats=D // 8)          # (n, D)
            query_embed = jnp.tile(emb, (1, 2))                               # (n, 2D)
            if n_boxes < NQ:
                pad = NQ - n_boxes
                t_boxes = jnp.concatenate(
                    [t_boxes, -jnp.ones((pad, 4), jnp.float32)], axis=0)
                query_embed = jnp.concatenate(
                    [query_embed, jnp.full((pad, 2 * D), -10.0, jnp.float32)], axis=0)
                t_classes = jnp.concatenate(
                    [t_classes, -jnp.ones((pad,), jnp.int32)], axis=0)
            pred_boxes_l.append(t_boxes)
            query_embeds_l.append(query_embed)
            pred_classes_l.append(t_classes)
        query_embeds = jnp.stack(query_embeds_l)                              # (B, NQ, 2D)
        pred_boxes = jnp.stack(pred_boxes_l)                                  # (B, NQ, 4)
        pred_classes = jnp.stack(pred_classes_l)                              # (B, NQ)

        # input_proj: Pallas 1x1-conv + GroupNorm kernel (single feature level, NCHW native).
        src = input_proj_groupnorm(feat, self.conv_w, self.conv_b,
                                   self.gn_gamma, self.gn_beta)               # (B, D, Hf, Wf)

        # ref_points_mode == 'bbox'
        reference_points = pred_boxes[:, :, :2]

        # TODO(synk): the deformable transformer is an externally supplied module; replaced by
        # a deterministic plain-JAX stub producing per-decoder-layer hidden states hs.
        tgt, qpos = query_embeds[..., :D], query_embeds[..., D:]
        pooled_src = src.mean(axis=(2, 3))                                    # (B, D)
        ctx = jnp.tanh(pooled_src @ self.w_src)
        h = jnp.tanh(tgt + qpos + ctx[:, None, :]
                     + reference_points.mean(axis=-1, keepdims=True))
        hs_list = []
        for l in range(self.num_dec):
            h = jnp.tanh(h @ self.w_dec[l] + self.b_dec[l])
            hs_list.append(h)
        hs = jnp.stack(hs_list)                                               # (L, B, NQ, D)

        # Pose heads + 6D -> rotation matrix, all in the single fused Pallas heads kernel.
        outputs_translation, outputs_rotation = pose_heads(hs, self.t_params, self.r_params)

        out = {'pred_translation': outputs_translation[-1],
               'pred_rotation': outputs_rotation[-1],
               'pred_boxes': pred_boxes,
               'pred_classes': pred_classes}
        out['aux_outputs'] = [
            {'pred_translation': t, 'pred_rotation': r,
             'pred_boxes': pred_boxes, 'pred_classes': pred_classes}
            for t, r in zip(outputs_translation[:-1], outputs_rotation[:-1])]
        return out, n_boxes_per_sample


if __name__ == "__main__":
    key = jax.random.PRNGKey(0)
    k_model, k_img, k_b1, k_b2 = jax.random.split(key, 4)

    B, H_IMG, W_IMG = 2, 32, 32
    model = PoETPallas(k_model, hidden_dim=64, num_queries=8, n_classes=3,
                       num_decoder_layers=2, backbone_channels=16)

    images = jax.random.normal(k_img, (B, 3, H_IMG, W_IMG), jnp.float32)      # NCHW
    targets = [
        {'boxes': jax.random.uniform(k_b1, (3, 4), jnp.float32),
         'labels': jnp.array([1, 2, 3], jnp.int32)},
        {'boxes': jax.random.uniform(k_b2, (5, 4), jnp.float32),
         'labels': jnp.array([2, 1, 3, 1, 2], jnp.int32)},
    ]

    out, n_boxes_per_sample = model.forward(images, targets)
    jax.block_until_ready((out['pred_translation'], out['pred_rotation'],
                           out['pred_boxes'], out['pred_classes']))

    assert out['pred_translation'].shape == (B, 8, 3)
    assert out['pred_rotation'].shape == (B, 8, 3, 3)
    assert out['pred_boxes'].shape == (B, 8, 4)
    assert out['pred_classes'].shape == (B, 8)
    assert len(out['aux_outputs']) == 1
    assert n_boxes_per_sample == [3, 5]
    print("KERNEL_OK")
</pallas_src>

<mosaic_0001>
module attributes {stable_mosaic.version = 11 : i64} {
  func.func @_input_proj_kernel(%arg0: memref<2x16x256xbf16, #tpu.memory_space<vmem>>, %arg1: memref<64x16xbf16, #tpu.memory_space<vmem>>, %arg2: memref<64x1xf32, #tpu.memory_space<vmem>>, %arg3: memref<64x1xf32, #tpu.memory_space<vmem>>, %arg4: memref<64x1xf32, #tpu.memory_space<vmem>>, %arg5: memref<64x64xf32, #tpu.memory_space<vmem>>, %arg6: memref<2x64x256xf32, #tpu.memory_space<vmem>>) attributes {dimension_semantics = [], scalar_prefetch = 0 : i64, scratch_operands = 0 : i64, tpu.core_type = #tpu.core_type<tc>} {
    %c0 = arith.constant 0 : index
    %c0_0 = arith.constant 0 : index
    %0 = vector.load %arg1[%c0, %c0_0] : memref<64x16xbf16, #tpu.memory_space<vmem>>, vector<64x16xbf16>
    %c0_1 = arith.constant 0 : index
    %c0_2 = arith.constant 0 : index
    %1 = vector.load %arg2[%c0_1, %c0_2] : memref<64x1xf32, #tpu.memory_space<vmem>>, vector<64x1xf32>
    %c0_3 = arith.constant 0 : index
    %c0_4 = arith.constant 0 : index
    %2 = vector.load %arg3[%c0_3, %c0_4] : memref<64x1xf32, #tpu.memory_space<vmem>>, vector<64x1xf32>
    %c0_5 = arith.constant 0 : index
    %c0_6 = arith.constant 0 : index
    %3 = vector.load %arg4[%c0_5, %c0_6] : memref<64x1xf32, #tpu.memory_space<vmem>>, vector<64x1xf32>
    %c0_7 = arith.constant 0 : index
    %c0_8 = arith.constant 0 : index
    %4 = vector.load %arg5[%c0_7, %c0_8] : memref<64x64xf32, #tpu.memory_space<vmem>>, vector<64x64xf32>
    %c0_9 = arith.constant 0 : index
    %c0_10 = arith.constant 0 : index
    %c0_11 = arith.constant 0 : index
    %5 = vector.load %arg0[%c0_9, %c0_10, %c0_11] : memref<2x16x256xbf16, #tpu.memory_space<vmem>>, vector<1x16x256xbf16>
    %6 = vector.shape_cast %5 : vector<1x16x256xbf16> to vector<16x256xbf16>
    %cst = arith.constant dense<0.000000e+00> : vector<64x256xf32>
    %7 = tpu.matmul %0, %6, %cst {dimension_numbers = #tpu.dot_dimension_numbers<[1], [0], [0], [1], [0, 0, 1, 1], [], []>} : vector<64x16xbf16>, vector<16x256xbf16>, vector<64x256xf32> -> vector<64x256xf32>
    %8 = vector.broadcast %1 : vector<64x1xf32> to vector<64x256xf32>
    %9 = arith.addf %7, %8 : vector<64x256xf32>
    %cst_12 = arith.constant dense<0.000000e+00> : vector<64xf32>
    %10 = vector.multi_reduction <add>, %9, %cst_12 [1] : vector<64x256xf32> to vector<64xf32>
    %11 = vector.shape_cast %10 : vector<64xf32> to vector<64x1xf32>
    %cst_13 = arith.constant 2.560000e+02 : f32
    %12 = vector.broadcast %cst_13 : f32 to vector<64x1xf32>
    %13 = arith.divf %11, %12 : vector<64x1xf32>
    %cst_14 = arith.constant dense<0.000000e+00> : vector<64x1xf32>
    %14 = tpu.matmul %4, %13, %cst_14 {dimension_numbers = #tpu.dot_dimension_numbers<[1], [0], [0], [1], [0, 0, 1, 1], [], []>} : vector<64x64xf32>, vector<64x1xf32>, vector<64x1xf32> -> vector<64x1xf32>
    %15 = vector.broadcast %14 : vector<64x1xf32> to vector<64x256xf32>
    %16 = arith.subf %9, %15 : vector<64x256xf32>
    %17 = arith.mulf %16, %16 : vector<64x256xf32>
    %cst_15 = arith.constant dense<0.000000e+00> : vector<64xf32>
    %18 = vector.multi_reduction <add>, %17, %cst_15 [1] : vector<64x256xf32> to vector<64xf32>
    %19 = vector.shape_cast %18 : vector<64xf32> to vector<64x1xf32>
    %cst_16 = arith.constant 2.560000e+02 : f32
    %20 = vector.broadcast %cst_16 : f32 to vector<64x1xf32>
    %21 = arith.divf %19, %20 : vector<64x1xf32>
    %cst_17 = arith.constant dense<0.000000e+00> : vector<64x1xf32>
    %22 = tpu.matmul %4, %21, %cst_17 {dimension_numbers = #tpu.dot_dimension_numbers<[1], [0], [0], [1], [0, 0, 1, 1], [], []>} : vector<64x64xf32>, vector<64x1xf32>, vector<64x1xf32> -> vector<64x1xf32>
    %cst_18 = arith.constant 9.99999974E-6 : f32
    %23 = vector.broadcast %cst_18 : f32 to vector<64x1xf32>
    %24 = arith.addf %22, %23 : vector<64x1xf32>
    %25 = math.rsqrt %24 : vector<64x1xf32>
    %26 = arith.mulf %2, %25 : vector<64x1xf32>
    %27 = vector.broadcast %26 : vector<64x1xf32> to vector<64x256xf32>
    %28 = arith.mulf %16, %27 : vector<64x256xf32>
    %29 = vector.broadcast %3 : vector<64x1xf32> to vector<64x256xf32>
    %30 = arith.addf %28, %29 : vector<64x256xf32>
    %c0_19 = arith.constant 0 : index
    %c0_20 = arith.constant 0 : index
    %c0_21 = arith.constant 0 : index
    %31 = vector.load %arg6[%c0_19, %c0_20, %c0_21] : memref<2x64x256xf32, #tpu.memory_space<vmem>>, vector<1x64x256xf32>
    %32 = vector.shape_cast %31 : vector<1x64x256xf32> to vector<64x256xf32>
    %33 = vector.shape_cast %30 : vector<64x256xf32> to vector<1x64x256xf32>
    tpu.vector_store %arg6[%c0_19, %c0_20, %c0_21], %33 {strides = array<i32>} : memref<2x64x256xf32, #tpu.memory_space<vmem>>, vector<1x64x256xf32>,
    %c1 = arith.constant 1 : index
    %c0_22 = arith.constant 0 : index
    %c0_23 = arith.constant 0 : index
    %34 = vector.load %arg0[%c1, %c0_22, %c0_23] : memref<2x16x256xbf16, #tpu.memory_space<vmem>>, vector<1x16x256xbf16>
    %35 = vector.shape_cast %34 : vector<1x16x256xbf16> to vector<16x256xbf16>
    %cst_24 = arith.constant dense<0.000000e+00> : vector<64x256xf32>
    %36 = tpu.matmul %0, %35, %cst_24 {dimension_numbers = #tpu.dot_dimension_numbers<[1], [0], [0], [1], [0, 0, 1, 1], [], []>} : vector<64x16xbf16>, vector<16x256xbf16>, vector<64x256xf32> -> vector<64x256xf32>
    %37 = vector.broadcast %1 : vector<64x1xf32> to vector<64x256xf32>
    %38 = arith.addf %36, %37 : vector<64x256xf32>
    %cst_25 = arith.constant dense<0.000000e+00> : vector<64xf32>
    %39 = vector.multi_reduction <add>, %38, %cst_25 [1] : vector<64x256xf32> to vector<64xf32>
    %40 = vector.shape_cast %39 : vector<64xf32> to vector<64x1xf32>
    %cst_26 = arith.constant 2.560000e+02 : f32
    %41 = vector.broadcast %cst_26 : f32 to vector<64x1xf32>
    %42 = arith.divf %40, %41 : vector<64x1xf32>
    %cst_27 = arith.constant dense<0.000000e+00> : vector<64x1xf32>
    %43 = tpu.matmul %4, %42, %cst_27 {dimension_numbers = #tpu.dot_dimension_numbers<[1], [0], [0], [1], [0, 0, 1, 1], [], []>} : vector<64x64xf32>, vector<64x1xf32>, vector<64x1xf32> -> vector<64x1xf32>
    %44 = vector.broadcast %43 : vector<64x1xf32> to vector<64x256xf32>
    %45 = arith.subf %38, %44 : vector<64x256xf32>
    %46 = arith.mulf %45, %45 : vector<64x256xf32>
    %cst_28 = arith.constant dense<0.000000e+00> : vector<64xf32>
    %47 = vector.multi_reduction <add>, %46, %cst_28 [1] : vector<64x256xf32> to vector<64xf32>
    %48 = vector.shape_cast %47 : vector<64xf32> to vector<64x1xf32>
    %cst_29 = arith.constant 2.560000e+02 : f32
    %49 = vector.broadcast %cst_29 : f32 to vector<64x1xf32>
    %50 = arith.divf %48, %49 : vector<64x1xf32>
    %cst_30 = arith.constant dense<0.000000e+00> : vector<64x1xf32>
    %51 = tpu.matmul %4, %50, %cst_30 {dimension_numbers = #tpu.dot_dimension_numbers<[1], [0], [0], [1], [0, 0, 1, 1], [], []>} : vector<64x64xf32>, vector<64x1xf32>, vector<64x1xf32> -> vector<64x1xf32>
    %cst_31 = arith.constant 9.99999974E-6 : f32
    %52 = vector.broadcast %cst_31 : f32 to vector<64x1xf32>
    %53 = arith.addf %51, %52 : vector<64x1xf32>
    %54 = math.rsqrt %53 : vector<64x1xf32>
    %55 = arith.mulf %2, %54 : vector<64x1xf32>
    %56 = vector.broadcast %55 : vector<64x1xf32> to vector<64x256xf32>
    %57 = arith.mulf %45, %56 : vector<64x256xf32>
    %58 = vector.broadcast %3 : vector<64x1xf32> to vector<64x256xf32>
    %59 = arith.addf %57, %58 : vector<64x256xf32>
    %c1_32 = arith.constant 1 : index
    %c0_33 = arith.constant 0 : index
    %c0_34 = arith.constant 0 : index
    %60 = vector.load %arg6[%c1_32, %c0_33, %c0_34] : memref<2x64x256xf32, #tpu.memory_space<vmem>>, vector<1x64x256xf32>
    %61 = vector.shape_cast %60 : vector<1x64x256xf32> to vector<64x256xf32>
    %62 = vector.shape_cast %59 : vector<64x256xf32> to vector<1x64x256xf32>
    tpu.vector_store %arg6[%c1_32, %c0_33, %c0_34], %62 {strides = array<i32>} : memref<2x64x256xf32, #tpu.memory_space<vmem>>, vector<1x64x256xf32>,
    return
  }
}

</mosaic_0001>

<bundles_post_ra>
// kernel: tpu_custom_call.1
= control target key start
LH: loop header
LB: loop body
LE: loop exit
PB: predicated region body
PF: predicated region fallthrough
CT: control target
= control target key end

     0   :  { %v1662_v2 = vmov 0   ;;  %vm137_vm0 = vcmask 130048   ;;  %s2407_s0 = inlined_call_operand.vmem [shape: bf16[2,16,256], index: 0, kind: input, shape index: {}]   ;;  %s2408_s1 = inlined_call_operand.vmem [shape: bf16[64,16], index: 1, kind: input, shape index: {}]   ;;  %s2409_s2 = inlined_call_operand.vmem [shape: f32[64,1], index: 2, kind: input, shape index: {}]   ;;  %s2410_s3 = inlined_call_operand.vmem [shape: f32[64,1], index: 3, kind: input, shape index: {}]   ;;  %s2411_s4 = inlined_call_operand.vmem [shape: f32[64,1], index: 4, kind: input, shape index: {}]   ;;  %s2412_s5 = inlined_call_operand.vmem [shape: f32[64,64], index: 5, kind: input, shape index: {}]   ;;  %s2413_s6 = inlined_call_operand.hbm [shape: f32[2,64,256], index: 6, kind: output, shape index: {}]  }
   0x1   :  { %v1596_v0 = vld [vmem:[%s2407_s0 + $0x4] ss:$8 sps:$4 sm:$0xff]   ;;  %v1598_v1 = vld [vmem:[%s2407_s0] ss:$8 sps:$4 sm:$0xff]   ;;  %182 = vmatprep.mubr.bf16.mxu0 %v1662_v2  ;;  %1594 = vset.pattern.permute.xlu0 %v1662_v2  ;;  %v1603_v4 = vld [vmem:[%s2407_s0 + $0x10] ss:$8 sps:$4 sm:$0xff]  }
   0x2   :  { %150 = vmatprep.subr.bf16.mxu0 %v1596_v0  ;;  %v1599_v3 = vld [vmem:[%s2408_s1] sm:$0xff]   ;;  %1595 = vset.pattern.permute.xlu1 %v1662_v2  ;;  %v1605_v5 = vld [vmem:[%s2407_s0 + $0x14] ss:$8 sps:$4 sm:$0xff]   ;;  %v34_v8 = vld [vmem:[%s2409_s2 + $0x8] sm:$0xff] }
   0x3   :  { %151 = vmatpush1.bf16.msra.mxu0 %v1598_v1  ;;  %v33_v6 = vld [vmem:[%s2409_s2] sm:$0xff]  ;;  %v35_v7 = vld [vmem:[%s2409_s2 + $0x10] sm:$0xff]  ;;  %v36_v9 = vld [vmem:[%s2409_s2 + $0x18] sm:$0xff] }
   0x4   :  { %69 = vperm.xlu0 %1594, %v33_v6   ;;  %752 = vmatprep.subr.bf16.mxu0 %v1605_v5 }
   0x5   :  { %79 = vperm.xlu1 %1595, %v35_v7  }
   0x6   :  { %1298 = vmatmul.mubr.msk.bf16.vlgmr.msra.gmra.mrb[0].mxu0 %vm137_vm0, %v1599_v3 }
   0x7   :  { %192 = vmatprep.mubr.bf16.mxu0 %v1662_v2  ;;  %753 = vmatpush1.bf16.msra.mxu0 %v1603_v4 }
   0x8   :  { %11 = vsyncpa [#allocation3], 0  ;;  %v1600_v10 = vld [vmem:[%s2408_s1 + $0x8] sm:$0xff]   ;;  %74 = vperm.xlu0 %1594, %v34_v8   ;;  %v37_v11 = vld [vmem:[%s2409_s2 + $0x20] sm:$0xff]  ;;  %vm256_vm1 = vcmask 523264  }
   0x9   :  { %84 = vperm.xlu1 %1595, %v36_v9   ;;  %v38_v12 = vld [vmem:[%s2409_s2 + $0x28] sm:$0xff]  ;;  %v39_v13 = vld [vmem:[%s2409_s2 + $0x30] sm:$0xff]  ;;  %v40_v14 = vld [vmem:[%s2409_s2 + $0x38] sm:$0xff] }
   0xa   :  { %v1601_v15 = vld [vmem:[%s2408_s1 + $0x10] sm:$0xff]   ;;  %v1602_v16 = vld [vmem:[%s2408_s1 + $0x18] sm:$0xff]  }
   0xc   :  { %89 = vperm.xlu0 %1594, %v37_v11  }
   0xd   :  { %94 = vperm.xlu1 %1595, %v38_v12  }
   0xe   :  { %1299 = vmatmul.mubr.msk.bf16.gmra.mrb[4].mxu0 %vm137_vm0, %v1600_v10 }
   0xf   :  { %202 = vmatprep.mubr.bf16.mxu0 %v1662_v2 }
  0x10   :  { %99 = vperm.xlu0 %1594, %v39_v13   ;;  %v1864_v13 = vld [vmem:[%s2412_s5] sm:$0xff] }
  0x11   :  { %104 = vperm.xlu1 %1595, %v40_v14   ;;  %1422 = vmatprep.mubr.msk.f32.mxu1 %vm256_vm1, %v1864_v13 }
  0x16   :  { %1300 = vmatmul.mubr.msk.bf16.gmra.mrb[8].mxu0 %vm137_vm0, %v1601_v15 }
  0x17   :  { %212 = vmatprep.mubr.bf16.mxu0 %v1662_v2 }
  0x1e   :  { %1301 = vmatmul.mubr.msk.bf16.gmra.mrb[12].mxu0 %vm137_vm0, %v1602_v16 }
  0x1f   :  { %784 = vmatprep.mubr.bf16.mxu0 %v1662_v2 }
  0x26   :  { %1322 = vmatmul.mubr.msk.bf16.vlgmr.msra.gmra.mrb[16].mxu0 %vm137_vm0, %v1599_v3 }
  0x27   :  { %794 = vmatprep.mubr.bf16.mxu0 %v1662_v2 }
  0x2e   :  { %1323 = vmatmul.mubr.msk.bf16.gmra.mrb[20].mxu0 %vm137_vm0, %v1600_v10 }
  0x2f   :  { %804 = vmatprep.mubr.bf16.mxu0 %v1662_v2 }
  0x36   :  { %1324 = vmatmul.mubr.msk.bf16.gmra.mrb[24].mxu0 %vm137_vm0, %v1601_v15 }
  0x37   :  { %814 = vmatprep.mubr.bf16.mxu0 %v1662_v2 }
  0x3e   :  { %1325 = vmatmul.mubr.msk.bf16.gmra.mrb[28].mxu0 %vm137_vm0, %v1602_v16 }
  0x3f   :  { %1506 = vmatprep.mubr.msk.f32.mxu0 %vm256_vm1, %v1864_v13 }
  0x83   :  { %v1757_v17 = vpop.permute.xlu0 %69 }
  0x84   :  { %v1775_v28 = vpop.permute.xlu1 %79 }
  0x87   :  { %v1759_v19 = vpop.permute.xlu0 %74 }
  0x88   :  { %v1785_v35 = vpop.permute.xlu1 %84 }
  0x8b   :  { %v1795_v40 = vpop.permute.xlu0 %89 }
  0x8c   :  { %v1802_v45 = vpop.permute.xlu1 %94 }
  0x8f   :  { %v1817_v53 = vpop.permute.xlu0 %99 }
  0x90   :  { %v1822_v57 = vpop.permute.xlu1 %104 }
  0xd9   :  { %v184_v18 = vpop.f32.mrb[0].mxu0 }
  0xda   :  { %v1762_v20 = vadd.f32 %v184_v18, %v1757_v17  ;;  %v186_v21 = vpop.f32.mrb[1].mxu0 }
  0xdb   :  { %v1765_v22 = vadd.f32 %v186_v21, %v1757_v17  ;;  %v188_v23 = vpop.f32.mrb[2].mxu0 }
  0xdc   :  { %v1768_v24 = vadd.f32 %v188_v23, %v1759_v19  ;;  %v190_v25 = vpop.f32.mrb[3].mxu0 }
  0xdd   :  { %v1771_v26 = vadd.f32 %v190_v25, %v1759_v19  ;;  %v223_v27 = vadd.f32 %v1765_v22, %v1762_v20 }
  0xdf   :  { %224 = vadd.xlane.f32.xlu0 %v223_v27  ;;  %v226_v29 = vadd.f32 %v1771_v26, %v1768_v24 }
  0xe1   :  { %v194_v30 = vpop.f32.mrb[4].mxu0  ;;  %227 = vadd.xlane.f32.xlu1 %v226_v29 }
  0xe2   :  { %v1780_v31 = vadd.f32 %v194_v30, %v1775_v28  ;;  %v196_v32 = vpop.f32.mrb[5].mxu0 }
  0xe3   :  { %v1783_v33 = vadd.f32 %v196_v32, %v1775_v28  ;;  %v198_v34 = vpop.f32.mrb[6].mxu0 }
  0xe4   :  { %v200_v36 = vpop.f32.mrb[7].mxu0  ;;  %v1788_v37 = vadd.f32 %v198_v34, %v1785_v35 }
  0xe5   :  { %v1791_v38 = vadd.f32 %v200_v36, %v1785_v35  ;;  %v229_v39 = vadd.f32 %v1783_v33, %v1780_v31 }
  0xe7   :  { %230 = vadd.xlane.f32.xlu0 %v229_v39  ;;  %v232_v42 = vadd.f32 %v1791_v38, %v1788_v37 }
  0xe9   :  { %v204_v41 = vpop.f32.mrb[8].mxu0 }
  0xea   :  { %v1800_v43 = vadd.f32 %v204_v41, %v1795_v40  ;;  %v206_v44 = vpop.f32.mrb[9].mxu0 }
  0xeb   :  { %v1805_v46 = vadd.f32 %v206_v44, %v1795_v40  ;;  %v208_v47 = vpop.f32.mrb[10].mxu0  ;;  %233 = vadd.xlane.f32.xlu0 %v232_v42 }
  0xec   :  { %v1808_v48 = vadd.f32 %v208_v47, %v1802_v45  ;;  %v210_v49 = vpop.f32.mrb[11].mxu0 }
  0xed   :  { %v1811_v50 = vadd.f32 %v210_v49, %v1802_v45  ;;  %v235_v51 = vadd.f32 %v1805_v46, %v1800_v43 }
  0xef   :  { %236 = vadd.xlane.f32.xlu1 %v235_v51  ;;  %v238_v52 = vadd.f32 %v1811_v50, %v1808_v48 }
  0xf1   :  { %v214_v54 = vpop.f32.mrb[12].mxu0  ;;  %239 = vadd.xlane.f32.xlu0 %v238_v52 }
  0xf2   :  { %v1820_v55 = vadd.f32 %v214_v54, %v1817_v53  ;;  %v216_v56 = vpop.f32.mrb[13].mxu0 }
  0xf3   :  { %v1825_v58 = vadd.f32 %v216_v56, %v1817_v53  ;;  %v218_v59 = vpop.f32.mrb[14].mxu0 }
  0xf4   :  { %v1828_v60 = vadd.f32 %v218_v59, %v1822_v57  ;;  %v220_v61 = vpop.f32.mrb[15].mxu0 }
  0xf5   :  { %v1831_v62 = vadd.f32 %v220_v61, %v1822_v57  ;;  %v241_v63 = vadd.f32 %v1825_v58, %v1820_v55  ;;  %v1881_v61 = vld [vmem:[%s2412_s5 + $0x8] sm:$0xff] }
  0xf7   :  { %242 = vadd.xlane.f32.xlu1 %v241_v63  ;;  %v244_v0 = vadd.f32 %v1831_v62, %v1828_v60  ;;  %v1886_v63 = vld [vmem:[%s2412_s5 + $0x10] sm:$0xff] }
  0xf9   :  { %v1837_v1 = vpop.f32.mrb[16].mxu0  ;;  %245 = vadd.xlane.f32.xlu0 %v244_v0  ;;  %v1895_v0 = vld [vmem:[%s2412_s5 + $0x18] sm:$0xff] }
  0xfa   :  { %v1839_v2 = vpop.f32.mrb[17].mxu0 }
  0xfb   :  { %v1841_v3 = vpop.f32.mrb[18].mxu0 }
  0xfc   :  { %v1843_v4 = vpop.f32.mrb[19].mxu0 }
 0x101   :  { %v1845_v5 = vpop.f32.mrb[20].mxu0 }
 0x102   :  { %v1847_v6 = vpop.f32.mrb[21].mxu0 }
 0x103   :  { %v1849_v7 = vpop.f32.mrb[22].mxu0 }
 0x104   :  { %v1851_v8 = vpop.f32.mrb[23].mxu0 }
 0x109   :  { %v1853_v9 = vpop.f32.mrb[24].mxu0 }
 0x10a   :  { %v1855_v10 = vpop.f32.mrb[25].mxu0 }
 0x10b   :  { %v1857_v11 = vpop.f32.mrb[26].mxu0 }
 0x10c   :  { %v1859_v12 = vpop.f32.mrb[27].mxu0 }
 0x111   :  { %v1870_v14 = vpop.f32.mrb[28].mxu0 }
 0x112   :  { %v1872_v15 = vpop.f32.mrb[29].mxu0 }
 0x113   :  { %v1874_v16 = vpop.f32.mrb[30].mxu0 }
 0x114   :  { %v1876_v18 = vpop.f32.mrb[31].mxu0 }
 0x16c   :  { %v225_v21 = vpop.xlane.xlu0 %224 }
 0x16d   :  { %v248_v25 = vmul.f32 0.00390625, %v225_v21  ;;  %v1900_v21 = vld [vmem:[%s2412_s5 + $0x20] sm:$0xff] }
 0x16e   :  { %v228_v23 = vpop.xlane.xlu1 %227 }
 0x16f   :  { %v249_v27 = vmul.f32 0.00390625, %v228_v23  ;;  %v1909_v23 = vld [vmem:[%s2412_s5 + $0x28] sm:$0xff] }
 0x171   :  { %v1518_v29 = vpack.c.bf16 %v249_v27, %v248_v25  ;;  %v1914_v25 = vld [vmem:[%s2412_s5 + $0x30] sm:$0xff]  ;;  %v1923_v27 = vld [vmem:[%s2412_s5 + $0x38] sm:$0xff] }
 0x173   :  { %1519 = vmatprep.subr.bf16.mxu1 %v1518_v29 }
 0x174   :  { %1521 = vmatpush3.bf16.msra.mxu1 %v1518_v29  ;;  %v231_v30 = vpop.xlane.xlu0 %230 }
 0x175   :  { %v250_v34 = vmul.f32 0.00390625, %v231_v30 }
 0x178   :  { %v234_v32 = vpop.xlane.xlu0 %233 }
 0x179   :  { %v251_v36 = vmul.f32 0.00390625, %v234_v32 }
 0x17b   :  { %v1522_v39 = vpack.c.bf16 %v251_v36, %v250_v34 }
 0x17c   :  { %v237_v41 = vpop.xlane.xlu1 %236 }
 0x17d   :  { %1523 = vmatprep.subr.bf16.mxu1 %v1522_v39  ;;  %v252_v44 = vmul.f32 0.00390625, %v237_v41 }
 0x17e   :  { %1525 = vmatpush3.bf16.msra.mxu1 %v1522_v39  ;;  %v240_v42 = vpop.xlane.xlu0 %239 }
 0x17f   :  { %v253_v47 = vmul.f32 0.00390625, %v240_v42 }
 0x181   :  { %v1526_v49 = vpack.c.bf16 %v253_v47, %v252_v44 }
 0x183   :  { %1527 = vmatprep.subr.bf16.mxu1 %v1526_v49 }
 0x184   :  { %v243_v51 = vpop.xlane.xlu1 %242  ;;  %1529 = vmatpush3.bf16.msra.mxu1 %v1526_v49 }
 0x185   :  { %v254_v54 = vmul.f32 0.00390625, %v243_v51 }
 0x186   :  { %v246_v52 = vpop.xlane.xlu0 %245 }
 0x187   :  { %v255_v56 = vmul.f32 0.00390625, %v246_v52 }
 0x189   :  { %v1530_v59 = vpack.c.bf16 %v255_v56, %v254_v54 }
 0x18b   :  { %1531 = vmatprep.subr.bf16.mxu1 %v1530_v59 }
 0x18c   :  { %1533 = vmatpush3.bf16.msra.mxu1 %v1530_v59 }
 0x18f   :  { %1423 = vmatmul.mubr.msk.f32.vlgmr.msra.gmra.mrb[0].mxu1 %vm256_vm1, %v1881_v61 }
 0x190   :  { %1425 = vmatprep.mubr.msk.f32.mxu1 %vm256_vm1, %v1886_v63 }
 0x193   :  { %1426 = vmatmul.mubr.msk.f32.gmra.mrb[2].mxu1 %vm256_vm1, %v1895_v0 }
 0x194   :  { %1428 = vmatprep.mubr.msk.f32.mxu1 %vm256_vm1, %v1900_v21 }
 0x197   :  { %1429 = vmatmul.mubr.msk.f32.gmra.mrb[4].mxu1 %vm256_vm1, %v1909_v23 }
 0x198   :  { %1431 = vmatprep.mubr.msk.f32.mxu1 %vm256_vm1, %v1914_v25 }
 0x19b   :  { %1432 = vmatmul.mubr.msk.f32.gmra.mrb[6].mxu1 %vm256_vm1, %v1923_v27 }
 0x19c   :  { %1450 = vmatprep.mubr.msk.f32.mxu1 %vm256_vm1, %v1864_v13 }
 0x262   :  { %v1424_v29 = vpop.f32.mrb[0].mxu1 }
 0x263   :  { %393 = vperm.xlu0 %1594, %v1424_v29   ;;  %v347_v30 = vpop.f32.mrb[1].mxu1 }
 0x264   :  { %388 = vperm.xlu1 %1595, %v347_v30  }
 0x266   :  { %v1427_v32 = vpop.f32.mrb[2].mxu1 }
 0x267   :  { %v357_v34 = vpop.f32.mrb[3].mxu1 }
 0x268   :  { %403 = vperm.xlu1 %1595, %v1427_v32  }
 0x26a   :  { %v1430_v36 = vpop.f32.mrb[4].mxu1 }
 0x26b   :  { %v367_v39 = vpop.f32.mrb[5].mxu1 }
 0x26c   :  { %398 = vperm.xlu1 %1595, %v357_v34   ;;  %408 = vperm.xlu0 %1594, %v367_v39  }
 0x26e   :  { %v1433_v41 = vpop.f32.mrb[6].mxu1 }
 0x26f   :  { %v377_v42 = vpop.f32.mrb[7].mxu1 }
 0x270   :  { %413 = vperm.xlu1 %1595, %v1430_v36   ;;  %418 = vperm.xlu0 %1594, %v377_v42  }
 0x274   :  { %423 = vperm.xlu1 %1595, %v1433_v41  }
 0x2e2   :  { %v394_v44 = vpop.permute.xlu0 %393 }
 0x2e3   :  { %v1930_v47 = vsub.f32 %v1768_v24, %v394_v44  ;;  %v1933_v49 = vsub.f32 %v1771_v26, %v394_v44  ;;  %v389_v51 = vpop.permute.xlu1 %388 }
 0x2e4   :  { %v1936_v52 = vsub.f32 %v1762_v20, %v389_v51  ;;  %v1939_v54 = vsub.f32 %v1765_v22, %v389_v51 }
 0x2e5   :  { %v444_v56 = vmul.f32 %v1930_v47, %v1930_v47  ;;  %v445_v59 = vmul.f32 %v1933_v49, %v1933_v49 }
 0x2e6   :  { %v442_v24 = vmul.f32 %v1936_v52, %v1936_v52  ;;  %v443_v26 = vmul.f32 %v1939_v54, %v1939_v54 }
 0x2e7   :  { %v404_v29 = vpop.permute.xlu1 %403  ;;  %v461_v30 = vadd.f32 %v445_v59, %v444_v56 }
 0x2e8   :  { %v1950_v20 = vsub.f32 %v1788_v37, %v404_v29  ;;  %v1953_v22 = vsub.f32 %v1791_v38, %v404_v29  ;;  %v458_v32 = vadd.f32 %v443_v26, %v442_v24 }
 0x2e9   :  { %462 = vadd.xlane.f32.xlu1 %v461_v30 }
 0x2ea   :  { %459 = vadd.xlane.f32.xlu0 %v458_v32  ;;  %v448_v34 = vmul.f32 %v1950_v20, %v1950_v20  ;;  %v449_v36 = vmul.f32 %v1953_v22, %v1953_v22 }
 0x2eb   :  { %v399_v39 = vpop.permute.xlu1 %398  ;;  %v409_v41 = vpop.permute.xlu0 %408 }
 0x2ec   :  { %v1960_v42 = vsub.f32 %v1780_v31, %v399_v39  ;;  %v1963_v37 = vsub.f32 %v1783_v33, %v399_v39  ;;  %v1966_v38 = vsub.f32 %v1800_v43, %v409_v41  ;;  %v1969_v44 = vsub.f32 %v1805_v46, %v409_v41 }
 0x2ed   :  { %v467_v51 = vadd.f32 %v449_v36, %v448_v34 }
 0x2ee   :  { %v450_v56 = vmul.f32 %v1966_v38, %v1966_v38  ;;  %v451_v59 = vmul.f32 %v1969_v44, %v1969_v44  ;;  %v446_v31 = vmul.f32 %v1960_v42, %v1960_v42  ;;  %v447_v33 = vmul.f32 %v1963_v37, %v1963_v37 }
 0x2ef   :  { %468 = vadd.xlane.f32.xlu0 %v467_v51  ;;  %v414_v24 = vpop.permute.xlu1 %413  ;;  %v419_v43 = vpop.permute.xlu0 %418 }
 0x2f0   :  { %v1980_v26 = vsub.f32 %v1808_v48, %v414_v24  ;;  %v1983_v46 = vsub.f32 %v1811_v50, %v414_v24  ;;  %v1986_v29 = vsub.f32 %v1820_v55, %v419_v43  ;;  %v1989_v30 = vsub.f32 %v1825_v58, %v419_v43 }
 0x2f1   :  { %v470_v32 = vadd.f32 %v451_v59, %v450_v56  ;;  %v464_v34 = vadd.f32 %v447_v33, %v446_v31  ;;  %v2007_v59 = vadd.f32 %v1837_v1, %v1757_v17  ;;  %v2011_v31 = vadd.f32 %v1839_v2, %v1757_v17 }
 0x2f2   :  { %v452_v36 = vmul.f32 %v1980_v26, %v1980_v26  ;;  %v453_v39 = vmul.f32 %v1983_v46, %v1983_v46  ;;  %v454_v48 = vmul.f32 %v1986_v29, %v1986_v29  ;;  %v455_v50 = vmul.f32 %v1989_v30, %v1989_v30 }
 0x2f3   :  { %471 = vadd.xlane.f32.xlu1 %v470_v32  ;;  %465 = vadd.xlane.f32.xlu0 %v464_v34  ;;  %v424_v55 = vpop.permute.xlu1 %423  ;;  %v2023_v1 = vadd.f32 %v1843_v4, %v1759_v19  ;;  %v2027_v17 = vadd.f32 %v1845_v5, %v1775_v28  ;;  %v2031_v2 = vadd.f32 %v1847_v6, %v1775_v28 }
 0x2f4   :  { %v2000_v58 = vsub.f32 %v1828_v60, %v424_v55  ;;  %v2003_v41 = vsub.f32 %v1831_v62, %v424_v55  ;;  %v473_v51 = vadd.f32 %v453_v39, %v452_v36  ;;  %v476_v56 = vadd.f32 %v455_v50, %v454_v48 }
 0x2f5   :  { %v2019_v62 = vadd.f32 %v1841_v3, %v1759_v19  ;;  %v825_v43 = vadd.f32 %v2011_v31, %v2007_v59  ;;  %v2037_v3 = vadd.f32 %v1849_v7, %v1785_v35  ;;  %v2041_v19 = vadd.f32 %v1851_v8, %v1785_v35 }
 0x2f6   :  { %v456_v33 = vmul.f32 %v2000_v58, %v2000_v58  ;;  %v457_v60 = vmul.f32 %v2003_v41, %v2003_v41  ;;  %v2045_v4 = vadd.f32 %v1853_v9, %v1795_v40  ;;  %v2049_v28 = vadd.f32 %v1855_v10, %v1795_v40 }
 0x2f7   :  { %474 = vadd.xlane.f32.xlu0 %v473_v51  ;;  %477 = vadd.xlane.f32.xlu1 %v476_v56  ;;  %v828_v5 = vadd.f32 %v2023_v1, %v2019_v62  ;;  %v831_v6 = vadd.f32 %v2031_v2, %v2027_v17  ;;  %v2057_v35 = vadd.f32 %v1857_v11, %v1802_v45 }
 0x2f8   :  { %v479_v24 = vadd.f32 %v457_v60, %v456_v33  ;;  %v834_v7 = vadd.f32 %v2041_v19, %v2037_v3  ;;  %v2063_v8 = vadd.f32 %v1859_v12, %v1802_v45  ;;  %v2067_v40 = vadd.f32 %v1870_v14, %v1817_v53 }
 0x2f9   :  { %v2071_v9 = vadd.f32 %v1872_v15, %v1817_v53  ;;  %v837_v10 = vadd.f32 %v2049_v28, %v2045_v4  ;;  %v2077_v11 = vadd.f32 %v1874_v16, %v1822_v57  ;;  %v2081_v45 = vadd.f32 %v1876_v18, %v1822_v57 }
 0x2fa   :  { %v840_v12 = vadd.f32 %v2063_v8, %v2057_v35 }
 0x2fb   :  { %480 = vadd.xlane.f32.xlu0 %v479_v24  ;;  %826 = vadd.xlane.f32.xlu1 %v825_v43  ;;  %v843_v53 = vadd.f32 %v2071_v9, %v2067_v40  ;;  %v846_v14 = vadd.f32 %v2081_v45, %v2077_v11 }
 0x2ff   :  { %829 = vadd.xlane.f32.xlu0 %v828_v5  ;;  %832 = vadd.xlane.f32.xlu1 %v831_v6 }
 0x303   :  { %835 = vadd.xlane.f32.xlu0 %v834_v7  ;;  %838 = vadd.xlane.f32.xlu1 %v837_v10 }
 0x307   :  { %841 = vadd.xlane.f32.xlu0 %v840_v12  ;;  %844 = vadd.xlane.f32.xlu1 %v843_v53 }
 0x30b   :  { %847 = vadd.xlane.f32.xlu0 %v846_v14 }
 0x376   :  { %v463_v15 = vpop.xlane.xlu1 %462 }
 0x377   :  { %v483_v32 = vmul.f32 0.00390625, %v463_v15  ;;  %v460_v16 = vpop.xlane.xlu0 %459 }
 0x378   :  { %v482_v34 = vmul.f32 0.00390625, %v460_v16 }
 0x37a   :  { %v1534_v36 = vpack.c.bf16 %v483_v32, %v482_v34 }
 0x37c   :  { %v469_v39 = vpop.xlane.xlu0 %468  ;;  %1535 = vmatprep.subr.bf16.mxu1 %v1534_v36 }
 0x37d   :  { %1537 = vmatpush3.bf16.msra.mxu1 %v1534_v36  ;;  %v485_v48 = vmul.f32 0.00390625, %v469_v39 }
 0x380   :  { %v472_v57 = vpop.xlane.xlu1 %471  ;;  %v466_v18 = vpop.xlane.xlu0 %465 }
 0x381   :  { %v484_v50 = vmul.f32 0.00390625, %v466_v18  ;;  %v486_v33 = vmul.f32 0.00390625, %v472_v57 }
 0x383   :  { %v1538_v55 = vpack.c.bf16 %v485_v48, %v484_v50 }
 0x384   :  { %v478_v51 = vpop.xlane.xlu1 %477  ;;  %v475_v56 = vpop.xlane.xlu0 %474 }
 0x385   :  { %v487_v60 = vmul.f32 0.00390625, %v475_v56  ;;  %1539 = vmatprep.subr.bf16.mxu1 %v1538_v55  ;;  %v488_v6 = vmul.f32 0.00390625, %v478_v51 }
 0x386   :  { %1541 = vmatpush3.bf16.msra.mxu1 %v1538_v55 }
 0x387   :  { %v1542_v24 = vpack.c.bf16 %v487_v60, %v486_v33 }
 0x388   :  { %v827_v43 = vpop.xlane.xlu1 %826  ;;  %v481_v5 = vpop.xlane.xlu0 %480 }
 0x389   :  { %v489_v7 = vmul.f32 0.00390625, %v481_v5  ;;  %1543 = vmatprep.subr.bf16.mxu1 %v1542_v24  ;;  %v849_v14 = vmul.f32 0.00390625, %v827_v43 }
 0x38a   :  { %1545 = vmatpush3.bf16.msra.mxu1 %v1542_v24 }
 0x38b   :  { %v1546_v10 = vpack.c.bf16 %v489_v7, %v488_v6 }
 0x38c   :  { %v833_v12 = vpop.xlane.xlu1 %832  ;;  %v830_v53 = vpop.xlane.xlu0 %829 }
 0x38d   :  { %v850_v15 = vmul.f32 0.00390625, %v830_v53  ;;  %1547 = vmatprep.subr.bf16.mxu1 %v1546_v10  ;;  %v851_v36 = vmul.f32 0.00390625, %v833_v12 }
 0x38e   :  { %1549 = vmatpush3.bf16.msra.mxu1 %v1546_v10 }
 0x38f   :  { %v1550_v32 = vpack.c.bf16 %v850_v15, %v849_v14 }
 0x390   :  { %v839_v16 = vpop.xlane.xlu1 %838  ;;  %v836_v34 = vpop.xlane.xlu0 %835 }
 0x391   :  { %v852_v39 = vmul.f32 0.00390625, %v836_v34  ;;  %1451 = vmatmul.mubr.msk.f32.vlgmr.msra.gmra.mrb[8].mxu1 %vm256_vm1, %v1881_v61  ;;  %1551 = vmatprep.subr.bf16.mxu1 %v1550_v32  ;;  %v853_v48 = vmul.f32 0.00390625, %v839_v16 }
 0x392   :  { %1553 = vmatpush3.bf16.msra.mxu1 %v1550_v32  ;;  %1453 = vmatprep.mubr.msk.f32.mxu1 %vm256_vm1, %v1886_v63 }
 0x393   :  { %v1554_v57 = vpack.c.bf16 %v852_v39, %v851_v36 }
 0x394   :  { %v842_v18 = vpop.xlane.xlu0 %841  ;;  %v845_v55 = vpop.xlane.xlu1 %844 }
 0x395   :  { %v854_v50 = vmul.f32 0.00390625, %v842_v18  ;;  %1454 = vmatmul.mubr.msk.f32.gmra.mrb[10].mxu1 %vm256_vm1, %v1895_v0  ;;  %1555 = vmatprep.subr.bf16.mxu1 %v1554_v57  ;;  %v855_v33 = vmul.f32 0.00390625, %v845_v55 }
 0x396   :  { %1557 = vmatpush3.bf16.msra.mxu1 %v1554_v57  ;;  %1456 = vmatprep.mubr.msk.f32.mxu1 %vm256_vm1, %v1900_v21 }
 0x397   :  { %v1558_v51 = vpack.c.bf16 %v854_v50, %v853_v48 }
 0x398   :  { %v848_v56 = vpop.xlane.xlu0 %847 }
 0x399   :  { %v856_v60 = vmul.f32 0.00390625, %v848_v56  ;;  %1457 = vmatmul.mubr.msk.f32.gmra.mrb[12].mxu1 %vm256_vm1, %v1909_v23  ;;  %1559 = vmatprep.subr.bf16.mxu1 %v1558_v51 }
 0x39a   :  { %1561 = vmatpush3.bf16.msra.mxu1 %v1558_v51  ;;  %1459 = vmatprep.mubr.msk.f32.mxu1 %vm256_vm1, %v1914_v25 }
 0x39b   :  { %v1562_v24 = vpack.c.bf16 %v856_v60, %v855_v33 }
 0x39d   :  { %1460 = vmatmul.mubr.msk.f32.gmra.mrb[14].mxu1 %vm256_vm1, %v1923_v27  ;;  %1563 = vmatprep.subr.bf16.mxu1 %v1562_v24 }
 0x39e   :  { %1565 = vmatpush3.bf16.msra.mxu1 %v1562_v24  ;;  %1478 = vmatprep.mubr.msk.f32.mxu1 %vm256_vm1, %v1864_v13 }
 0x3a1   :  { %1479 = vmatmul.mubr.msk.f32.vlgmr.msra.gmra.mrb[16].mxu1 %vm256_vm1, %v1881_v61 }
 0x3a2   :  { %1481 = vmatprep.mubr.msk.f32.mxu1 %vm256_vm1, %v1886_v63 }
 0x3a5   :  { %1482 = vmatmul.mubr.msk.f32.gmra.mrb[18].mxu1 %vm256_vm1, %v1895_v0 }
 0x3a6   :  { %1484 = vmatprep.mubr.msk.f32.mxu1 %vm256_vm1, %v1900_v21 }
 0x3a9   :  { %1485 = vmatmul.mubr.msk.f32.gmra.mrb[20].mxu1 %vm256_vm1, %v1909_v23 }
 0x3aa   :  { %1487 = vmatprep.mubr.msk.f32.mxu1 %vm256_vm1, %v1914_v25 }
 0x3ad   :  { %1488 = vmatmul.mubr.msk.f32.gmra.mrb[22].mxu1 %vm256_vm1, %v1923_v27 }
 0x3ae   :  { %1509 = vmatprep.mubr.msk.f32.mxu1 %vm256_vm1, %v1886_v63 }
 0x464   :  { %v2121_v13 = vpop.f32.mrb[8].mxu1 }
 0x465   :  { %v2123_v43 = vpop.f32.mrb[9].mxu1 }
 0x468   :  { %v2125_v5 = vpop.f32.mrb[10].mxu1 }
 0x469   :  { %v2127_v6 = vpop.f32.mrb[11].mxu1 }
 0x46c   :  { %v2129_v7 = vpop.f32.mrb[12].mxu1 }
 0x46d   :  { %v2131_v10 = vpop.f32.mrb[13].mxu1 }
 0x470   :  { %v2133_v12 = vpop.f32.mrb[14].mxu1 }
 0x471   :  { %v2135_v53 = vpop.f32.mrb[15].mxu1 }
 0x474   :  { %v1480_v14 = vpop.f32.mrb[16].mxu1 }
 0x475   :  { %969 = vperm.xlu0 %1594, %v1480_v14   ;;  %v923_v15 = vpop.f32.mrb[17].mxu1 }
 0x476   :  { %964 = vperm.xlu1 %1595, %v923_v15  }
 0x478   :  { %v1483_v63 = vpop.f32.mrb[18].mxu1 }
 0x479   :  { %v933_v32 = vpop.f32.mrb[19].mxu1 }
 0x47a   :  { %979 = vperm.xlu1 %1595, %v1483_v63  }
 0x47c   :  { %v1486_v16 = vpop.f32.mrb[20].mxu1 }
 0x47d   :  { %v943_v34 = vpop.f32.mrb[21].mxu1 }
 0x47e   :  { %974 = vperm.xlu1 %1595, %v933_v32   ;;  %984 = vperm.xlu0 %1594, %v943_v34  }
 0x480   :  { %v1489_v36 = vpop.f32.mrb[22].mxu1 }
 0x481   :  { %v953_v39 = vpop.f32.mrb[23].mxu1 }
 0x482   :  { %989 = vperm.xlu1 %1595, %v1486_v16   ;;  %994 = vperm.xlu0 %1594, %v953_v39  }
 0x486   :  { %999 = vperm.xlu1 %1595, %v1489_v36  }
 0x4f4   :  { %v970_v57 = vpop.permute.xlu0 %969 }
 0x4f5   :  { %v2138_v18 = vsub.f32 %v2019_v62, %v970_v57  ;;  %v2141_v48 = vsub.f32 %v2023_v1, %v970_v57  ;;  %v965_v50 = vpop.permute.xlu1 %964 }
 0x4f6   :  { %v2144_v55 = vsub.f32 %v2007_v59, %v965_v50  ;;  %v2147_v51 = vsub.f32 %v2011_v31, %v965_v50 }
 0x4f7   :  { %v1020_v56 = vmul.f32 %v2138_v18, %v2138_v18  ;;  %v1021_v33 = vmul.f32 %v2141_v48, %v2141_v48 }
 0x4f8   :  { %v1018_v62 = vmul.f32 %v2144_v55, %v2144_v55  ;;  %v1019_v1 = vmul.f32 %v2147_v51, %v2147_v51 }
 0x4f9   :  { %v980_v60 = vpop.permute.xlu1 %979  ;;  %v1037_v24 = vadd.f32 %v1021_v33, %v1020_v56 }
 0x4fa   :  { %v2158_v59 = vsub.f32 %v2037_v3, %v980_v60  ;;  %v2161_v31 = vsub.f32 %v2041_v19, %v980_v60  ;;  %v1034_v14 = vadd.f32 %v1019_v1, %v1018_v62 }
 0x4fb   :  { %1038 = vadd.xlane.f32.xlu1 %v1037_v24 }
 0x4fc   :  { %1035 = vadd.xlane.f32.xlu0 %v1034_v14  ;;  %v1024_v15 = vmul.f32 %v2158_v59, %v2158_v59  ;;  %v1025_v63 = vmul.f32 %v2161_v31, %v2161_v31 }
 0x4fd   :  { %v975_v32 = vpop.permute.xlu1 %974  ;;  %v985_v16 = vpop.permute.xlu0 %984 }
 0x4fe   :  { %v2168_v34 = vsub.f32 %v2027_v17, %v975_v32  ;;  %v2171_v3 = vsub.f32 %v2031_v2, %v975_v32  ;;  %v2174_v19 = vsub.f32 %v2045_v4, %v985_v16  ;;  %v2177_v36 = vsub.f32 %v2049_v28, %v985_v16 }
 0x4ff   :  { %v1043_v39 = vadd.f32 %v1025_v63, %v1024_v15 }
 0x500   :  { %v1026_v57 = vmul.f32 %v2174_v19, %v2174_v19  ;;  %v1027_v50 = vmul.f32 %v2177_v36, %v2177_v36  ;;  %v1022_v17 = vmul.f32 %v2168_v34, %v2168_v34  ;;  %v1023_v2 = vmul.f32 %v2171_v3, %v2171_v3 }
 0x501   :  { %1044 = vadd.xlane.f32.xlu0 %v1043_v39  ;;  %v990_v56 = vpop.permute.xlu1 %989  ;;  %v995_v4 = vpop.permute.xlu0 %994  ;;  %v557_v39 = vadd.f32 1e-05, %v2123_v43  ;;  %v582_v43 = vadd.f32 1e-05, %v2129_v7  ;;  %v2234_v7 = vld [vmem:[%s2410_s3 + $0x10] sm:$0xff] }
 0x502   :  { %v2188_v33 = vsub.f32 %v2057_v35, %v990_v56  ;;  %v2191_v28 = vsub.f32 %v2063_v8, %v990_v56  ;;  %v2194_v62 = vsub.f32 %v2067_v40, %v995_v4  ;;  %v2197_v1 = vsub.f32 %v2071_v9, %v995_v4 }
 0x503   :  { %v1046_v60 = vadd.f32 %v1027_v50, %v1026_v57  ;;  %v1040_v24 = vadd.f32 %v1023_v2, %v1022_v17  ;;  %1606 = vrsqrt.f32 %v557_v39  ;;  %v562_v2 = vadd.f32 1e-05, %v2121_v13  ;;  %v2257_v39 = vld [vmem:[%s2410_s3 + $0x20] sm:$0xff] }
 0x504   :  { %v1028_v14 = vmul.f32 %v2188_v33, %v2188_v33  ;;  %v1029_v15 = vmul.f32 %v2191_v28, %v2191_v28  ;;  %v1030_v35 = vmul.f32 %v2194_v62, %v2194_v62  ;;  %v1031_v8 = vmul.f32 %v2197_v1, %v2197_v1 }
 0x505   :  { %1047 = vadd.xlane.f32.xlu1 %v1046_v60  ;;  %1041 = vadd.xlane.f32.xlu0 %v1040_v24  ;;  %v1000_v40 = vpop.permute.xlu1 %999  ;;  %v577_v56 = vadd.f32 1e-05, %v2131_v10  ;;  %v2226_v60 = vld [vmem:[%s2410_s3] sm:$0xff] }
 0x506   :  { %v2208_v9 = vsub.f32 %v2077_v11, %v1000_v40  ;;  %v2211_v63 = vsub.f32 %v2081_v45, %v1000_v40  ;;  %v1049_v32 = vadd.f32 %v1029_v15, %v1028_v14  ;;  %v1052_v16 = vadd.f32 %v1031_v8, %v1030_v35  ;;  %v2245_v15 = vld [vmem:[%s2410_s3 + $0x8] sm:$0xff] }
 0x507   :  { %v567_v11 = vadd.f32 1e-05, %v2127_v6  ;;  %v572_v45 = vadd.f32 1e-05, %v2125_v5  ;;  %v592_v6 = vadd.f32 1e-05, %v2133_v12 }
 0x508   :  { %v1032_v57 = vmul.f32 %v2208_v9, %v2208_v9  ;;  %v1033_v50 = vmul.f32 %v2211_v63, %v2211_v63  ;;  %v587_v5 = vadd.f32 1e-05, %v2135_v53  ;;  %v2240_v12 = vld [vmem:[%s2410_s3 + $0x18] sm:$0xff] }
 0x509   :  { %1050 = vadd.xlane.f32.xlu0 %v1049_v32  ;;  %1053 = vadd.xlane.f32.xlu1 %v1052_v16  ;;  %1608 = vrsqrt.f32 %v567_v11  ;;  %v2252_v32 = vld [vmem:[%s2410_s3 + $0x28] sm:$0xff]  ;;  %v2264_v11 = vld [vmem:[%s2410_s3 + $0x38] sm:$0xff] }
 0x50a   :  { %v1055_v17 = vadd.f32 %v1033_v50, %v1032_v57  ;;  %1610 = vrsqrt.f32 %v572_v45 }
 0x50b   :  { %1612 = vrsqrt.f32 %v562_v2  ;;  %v2269_v2 = vld [vmem:[%s2410_s3 + $0x30] sm:$0xff] }
 0x50c   :  { %1614 = vrsqrt.f32 %v582_v43 }
 0x50d   :  { %1056 = vadd.xlane.f32.xlu0 %v1055_v17  ;;  %v1607_v4 = vpop.eup %1606  ;;  %1616 = vrsqrt.f32 %v577_v56 }
 0x50e   :  { %v603_v13 = vmul.f32 %v1607_v4, %v2226_v60  ;;  %1618 = vrsqrt.f32 %v592_v6  ;;  %v50_v4 = vld [vmem:[%s2411_s4 + $0x8] sm:$0xff]  ;;  %v49_v6 = vld [vmem:[%s2411_s4] sm:$0xff] }
 0x50f   :  { %1620 = vrsqrt.f32 %v587_v5  ;;  %v52_v5 = vld [vmem:[%s2411_s4 + $0x18] sm:$0xff] }
 0x513   :  { %v1609_v24 = vpop.eup %1608 }
 0x514   :  { %v605_v10 = vmul.f32 %v1609_v24, %v2234_v7  ;;  %v1611_v14 = vpop.eup %1610  ;;  %v54_v24 = vld [vmem:[%s2411_s4 + $0x28] sm:$0xff] }
 0x515   :  { %v1613_v53 = vpop.eup %1612  ;;  %v606_v35 = vmul.f32 %v1611_v14, %v2240_v12  ;;  %v55_v14 = vld [vmem:[%s2411_s4 + $0x30] sm:$0xff] }
 0x516   :  { %v1615_v8 = vpop.eup %1614  ;;  %v604_v40 = vmul.f32 %v1613_v53, %v2245_v15 }
 0x517   :  { %v1617_v16 = vpop.eup %1616  ;;  %v608_v57 = vmul.f32 %v1615_v8, %v2252_v32 }
 0x518   :  { %v1619_v50 = vpop.eup %1618  ;;  %v607_v17 = vmul.f32 %v1617_v16, %v2257_v39 }
 0x519   :  { %v1621_v45 = vpop.eup %1620  ;;  %v610_v43 = vmul.f32 %v1619_v50, %v2264_v11 }
 0x51a   :  { %613 = vperm.xlu1 %1595, %v603_v13   ;;  %v609_v56 = vmul.f32 %v1621_v45, %v2269_v2  ;;  %v51_v13 = vld [vmem:[%s2411_s4 + $0x10] sm:$0xff] }
 0x51e   :  { %623 = vperm.xlu1 %1595, %v605_v10   ;;  %v53_v10 = vld [vmem:[%s2411_s4 + $0x20] sm:$0xff] }
 0x522   :  { %628 = vperm.xlu1 %1595, %v606_v35  }
 0x523   :  { %618 = vperm.xlu0 %1594, %v604_v40  }
 0x526   :  { %638 = vperm.xlu1 %1595, %v608_v57  }
 0x527   :  { %633 = vperm.xlu0 %1594, %v607_v17  }
 0x52a   :  { %648 = vperm.xlu1 %1595, %v610_v43  }
 0x52b   :  { %643 = vperm.xlu0 %1594, %v609_v56  }
 0x52e   :  { %674 = vperm.xlu1 %1595, %v50_v4  }
 0x52f   :  { %669 = vperm.xlu0 %1594, %v49_v6  }
 0x532   :  { %684 = vperm.xlu1 %1595, %v52_v5  }
 0x533   :  { %679 = vperm.xlu0 %1594, %v51_v13  }
 0x536   :  { %694 = vperm.xlu1 %1595, %v54_v24  }
 0x537   :  { %689 = vperm.xlu0 %1594, %v53_v10  }
 0x53b   :  { %699 = vperm.xlu0 %1594, %v55_v14  }
 0x588   :  { %v1039_v53 = vpop.xlane.xlu1 %1038 }
 0x589   :  { %v1059_v35 = vmul.f32 0.00390625, %v1039_v53  ;;  %v1036_v8 = vpop.xlane.xlu0 %1035 }
 0x58a   :  { %v1058_v40 = vmul.f32 0.00390625, %v1036_v8 }
 0x58c   :  { %v1566_v16 = vpack.c.bf16 %v1059_v35, %v1058_v40 }
 0x58e   :  { %v1045_v57 = vpop.xlane.xlu0 %1044  ;;  %1567 = vmatprep.subr.bf16.mxu0 %v1566_v16  ;;  %1582 = vmatprep.subr.bf16.mxu1 %v1566_v16 }
 0x58f   :  { %1569 = vmatpush3.bf16.msra.mxu0 %v1566_v16  ;;  %1586 = vmatpush3.bf16.msra.mxu1 %v1566_v16  ;;  %v1061_v45 = vmul.f32 0.00390625, %v1045_v57 }
 0x592   :  { %v1048_v50 = vpop.xlane.xlu1 %1047  ;;  %v1042_v17 = vpop.xlane.xlu0 %1041 }
 0x593   :  { %v1060_v43 = vmul.f32 0.00390625, %v1042_v17  ;;  %v1062_v5 = vmul.f32 0.00390625, %v1048_v50 }
 0x595   :  { %v1570_v56 = vpack.c.bf16 %v1061_v45, %v1060_v43 }
 0x596   :  { %v1054_v4 = vpop.xlane.xlu1 %1053  ;;  %v1051_v6 = vpop.xlane.xlu0 %1050 }
 0x597   :  { %v1063_v13 = vmul.f32 0.00390625, %v1051_v6  ;;  %1571 = vmatprep.subr.bf16.mxu0 %v1570_v56  ;;  %1583 = vmatprep.subr.bf16.mxu1 %v1570_v56  ;;  %v1064_v53 = vmul.f32 0.00390625, %v1054_v4 }
 0x598   :  { %1573 = vmatpush3.bf16.msra.mxu0 %v1570_v56  ;;  %1587 = vmatpush3.bf16.msra.mxu1 %v1570_v56 }
 0x599   :  { %v1574_v24 = vpack.c.bf16 %v1063_v13, %v1062_v5 }
 0x59a   :  { %v614_v10 = vpop.permute.xlu1 %613  ;;  %v1057_v14 = vpop.xlane.xlu0 %1056 }
 0x59b   :  { %v1065_v35 = vmul.f32 0.00390625, %v1057_v14  ;;  %1575 = vmatprep.subr.bf16.mxu0 %v1574_v24  ;;  %1584 = vmatprep.subr.bf16.mxu1 %v1574_v24 }
 0x59c   :  { %1577 = vmatpush3.bf16.msra.mxu0 %v1574_v24  ;;  %1588 = vmatpush3.bf16.msra.mxu1 %v1574_v24 }
 0x59d   :  { %v1578_v8 = vpack.c.bf16 %v1065_v35, %v1064_v53 }
 0x59e   :  { %v624_v40 = vpop.permute.xlu1 %623 }
 0x59f   :  { %1579 = vmatprep.subr.bf16.mxu0 %v1578_v8  ;;  %1585 = vmatprep.subr.bf16.mxu1 %v1578_v8 }
 0x5a0   :  { %1581 = vmatpush3.bf16.msra.mxu0 %v1578_v8  ;;  %1589 = vmatpush3.bf16.msra.mxu1 %v1578_v8 }
 0x5a2   :  { %v629_v16 = vpop.permute.xlu1 %628  ;;  %v619_v57 = vpop.permute.xlu0 %618 }
 0x5a3   :  { %1507 = vmatmul.mubr.msk.f32.vlgmr.msra.gmra.mrb[32].mxu0 %vm256_vm1, %v1881_v61  ;;  %1510 = vmatmul.mubr.msk.f32.vlgmr.msra.gmra.mrb[24].mxu1 %vm256_vm1, %v1895_v0  ;;  %v651_v61 = vmul.f32 %v614_v10, %v1936_v52  ;;  %v652_v0 = vmul.f32 %v614_v10, %v1939_v54  ;;  %v654_v56 = vmul.f32 %v619_v57, %v1933_v49 }
 0x5a4   :  { %1512 = vmatprep.mubr.msk.f32.mxu1 %vm256_vm1, %v1900_v21  ;;  %v653_v21 = vmul.f32 %v619_v57, %v1930_v47  ;;  %v655_v52 = vmul.f32 %v624_v40, %v1960_v42  ;;  %v656_v54 = vmul.f32 %v624_v40, %v1963_v37  ;;  %v657_v47 = vmul.f32 %v629_v16, %v1950_v20 }
 0x5a5   :  { %v658_v49 = vmul.f32 %v629_v16, %v1953_v22 }
 0x5a6   :  { %v639_v50 = vpop.permute.xlu1 %638  ;;  %v634_v17 = vpop.permute.xlu0 %633 }
 0x5a7   :  { %1513 = vmatmul.mubr.msk.f32.gmra.mrb[26].mxu1 %vm256_vm1, %v1909_v23  ;;  %v661_v20 = vmul.f32 %v639_v50, %v1980_v26  ;;  %v662_v22 = vmul.f32 %v639_v50, %v1983_v46  ;;  %v659_v53 = vmul.f32 %v634_v17, %v1966_v38  ;;  %v660_v35 = vmul.f32 %v634_v17, %v1969_v44 }
 0x5a8   :  { %1515 = vmatprep.mubr.msk.f32.mxu1 %vm256_vm1, %v1914_v25 }
 0x5aa   :  { %v2304_v45 = vpop.permute.xlu1 %648  ;;  %v644_v43 = vpop.permute.xlu0 %643 }
 0x5ab   :  { %1516 = vmatmul.mubr.msk.f32.gmra.mrb[28].mxu1 %vm256_vm1, %v1923_v27  ;;  %v663_v38 = vmul.f32 %v644_v43, %v1986_v29  ;;  %v664_v44 = vmul.f32 %v644_v43, %v1989_v30 }
 0x5ae   :  { %v2312_v4 = vpop.permute.xlu1 %674  ;;  %v2314_v23 = vpop.permute.xlu0 %669 }
 0x5af   :  { %v709_v25 = vadd.f32 %v2312_v4, %v653_v21  ;;  %v710_v6 = vadd.f32 %v2312_v4, %v654_v56  ;;  %v707_v5 = vadd.f32 %v2314_v23, %v651_v61  ;;  %v708_v27 = vadd.f32 %v2314_v23, %v652_v0 }
 0x5b1   :  { %725 = vst [vmem:[#allocation2 + $0x10] sm:$0xff] %v709_v25  ;;  %726 = vst [vmem:[#allocation2 + $0x18] sm:$0xff] %v710_v6 }
 0x5b2   :  { %723 = vst [vmem:[#allocation2] sm:$0xff] %v707_v5  ;;  %724 = vst [vmem:[#allocation2 + $0x8] sm:$0xff] %v708_v27  ;;  %v2324_v13 = vpop.permute.xlu1 %684  ;;  %v2326_v24 = vpop.permute.xlu0 %679 }
 0x5b3   :  { %v713_v10 = vadd.f32 %v2324_v13, %v657_v47  ;;  %v714_v14 = vadd.f32 %v2324_v13, %v658_v49  ;;  %v711_v42 = vadd.f32 %v2326_v24, %v655_v52  ;;  %v712_v37 = vadd.f32 %v2326_v24, %v656_v54 }
 0x5b5   :  { %729 = vst [vmem:[#allocation2 + $0x30] sm:$0xff] %v713_v10  ;;  %730 = vst [vmem:[#allocation2 + $0x38] sm:$0xff] %v714_v14 }
 0x5b6   :  { %727 = vst [vmem:[#allocation2 + $0x20] sm:$0xff] %v711_v42  ;;  %728 = vst [vmem:[#allocation2 + $0x28] sm:$0xff] %v712_v37  ;;  %v2336_v8 = vpop.permute.xlu1 %694  ;;  %v2338_v40 = vpop.permute.xlu0 %689 }
 0x5b7   :  { %v717_v16 = vadd.f32 %v2336_v8, %v661_v20  ;;  %v718_v57 = vadd.f32 %v2336_v8, %v662_v22  ;;  %v715_v26 = vadd.f32 %v2338_v40, %v659_v53  ;;  %v716_v46 = vadd.f32 %v2338_v40, %v660_v35 }
 0x5b9   :  { %733 = vst [vmem:[#allocation2 + $0x50] sm:$0xff] %v717_v16  ;;  %734 = vst [vmem:[#allocation2 + $0x58] sm:$0xff] %v718_v57 }
 0x5ba   :  { %731 = vst [vmem:[#allocation2 + $0x40] sm:$0xff] %v715_v26  ;;  %732 = vst [vmem:[#allocation2 + $0x48] sm:$0xff] %v716_v46  ;;  %v2346_v50 = vpop.permute.xlu0 %699 }
 0x5bb   :  { %v719_v17 = vadd.f32 %v2346_v50, %v663_v38  ;;  %v720_v61 = vadd.f32 %v2346_v50, %v664_v44 }
 0x5bd   :  { %735 = vst [vmem:[#allocation2 + $0x60] sm:$0xff] %v719_v17  ;;  %736 = vst [vmem:[#allocation2 + $0x68] sm:$0xff] %v720_v61 }
 0x676   :  { %v1508_v0 = vpop.f32.mrb[32].mxu0  ;;  %v1511_v25 = vpop.f32.mrb[24].mxu1 }
 0x677   :  { %v1138_v21 = vadd.f32 1e-05, %v1508_v0  ;;  %v1132_v56 = vpop.f32.mrb[33].mxu0  ;;  %v1148_v29 = vadd.f32 1e-05, %v1511_v25  ;;  %v1142_v5 = vpop.f32.mrb[25].mxu1 }
 0x678   :  { %v1133_v6 = vadd.f32 1e-05, %v1132_v56  ;;  %v1143_v30 = vadd.f32 1e-05, %v1142_v5 }
 0x679   :  { %1622 = vrsqrt.f32 %v1138_v21 }
 0x67a   :  { %1624 = vrsqrt.f32 %v1133_v6  ;;  %v1514_v43 = vpop.f32.mrb[26].mxu1 }
 0x67b   :  { %1626 = vrsqrt.f32 %v1148_v29  ;;  %v1158_v27 = vadd.f32 1e-05, %v1514_v43  ;;  %v1152_v52 = vpop.f32.mrb[27].mxu1 }
 0x67c   :  { %1628 = vrsqrt.f32 %v1143_v30  ;;  %v1153_v54 = vadd.f32 1e-05, %v1152_v52 }
 0x67d   :  { %1630 = vrsqrt.f32 %v1158_v27 }
 0x67e   :  { %1632 = vrsqrt.f32 %v1153_v54  ;;  %v1517_v47 = vpop.f32.mrb[28].mxu1 }
 0x67f   :  { %v1168_v49 = vadd.f32 1e-05, %v1517_v47  ;;  %v1162_v10 = vpop.f32.mrb[29].mxu1 }
 0x680   :  { %v1163_v14 = vadd.f32 1e-05, %v1162_v10 }
 0x681   :  { %1634 = vrsqrt.f32 %v1168_v49 }
 0x682   :  { %1636 = vrsqrt.f32 %v1163_v14 }
 0x683   :  { %v1623_v42 = vpop.eup %1622 }
 0x684   :  { %v1625_v37 = vpop.eup %1624  ;;  %v1180_v20 = vmul.f32 %v1623_v42, %v2245_v15 }
 0x685   :  { %v1627_v22 = vpop.eup %1626  ;;  %v1179_v53 = vmul.f32 %v1625_v37, %v2226_v60 }
 0x686   :  { %v1629_v35 = vpop.eup %1628  ;;  %1194 = vperm.xlu0 %1594, %v1180_v20   ;;  %v1182_v16 = vmul.f32 %v1627_v22, %v2240_v12 }
 0x687   :  { %1189 = vperm.xlu1 %1595, %v1179_v53   ;;  %v1181_v57 = vmul.f32 %v1629_v35, %v2234_v7  ;;  %v1631_v26 = vpop.eup %1630  ;;  %v56_v7 = vld [vmem:[%s2411_s4 + $0x38] sm:$0xff]  ;;  %s1663_s4 = smov [#allocation2]  }
 0x688   :  { %v1633_v46 = vpop.eup %1632  ;;  %v1184_v38 = vmul.f32 %v1631_v26, %v2252_v32  ;;  %s1281_s19 = sshll.u32 %s1663_s4, 4  ;;  %s1282_s19 = int_to_ptr.vmem [resolvable:$true] %s1281_s19 }
 0x689   :  { %v1183_v44 = vmul.f32 %v1633_v46, %v2257_v39  ;;  %s1638_s20 = scalar_lea.vmem %s1282_s19, 4096  ;;  %p1643_p1 = scmp.lt.s32.totalorder %s1282_s19, %s1282_s19 }
 0x68a   :  { %1204 = vperm.xlu0 %1594, %v1182_v16   ;;  %p1639_p0 = scmp.ne.s32.totalorder %s1282_s19, %s1638_s20  ;;  %p1644_p2 = scmp.lt.s32.totalorder %s1638_s20, %s1638_s20 }
 0x68b   :  { %1199 = vperm.xlu1 %1595, %v1181_v57   ;;  %v1635_v17 = vpop.eup %1634 }
 0x68c   :  { %v1637_v15 = vpop.eup %1636  ;;  %v1186_v60 = vmul.f32 %v1635_v17, %v2264_v11  ;;  %p1645_p3 = por %p1644_p2, %p1643_p1 }
 0x68d   :  { %v1185_v61 = vmul.f32 %v1637_v15, %v2269_v2 }
 0x68e   :  { %1214 = vperm.xlu0 %1594, %v1184_v38   ;;  %p1646_p4 = pnand %p1645_p3, %p1639_p0 }
 0x68f   :  { %1209 = vperm.xlu1 %1595, %v1183_v44  }
 0x692   :  { %1224 = vperm.xlu0 %1594, %v1186_v60  }
 0x693   :  { %1219 = vperm.xlu1 %1595, %v1185_v61  }
 0x697   :  { %704 = vperm.xlu1 %1595, %v56_v7  }
 0x705   :  { %v1195_v12 = vpop.permute.xlu0 %1194 }
 0x706   :  { %v1229_v32 = vmul.f32 %v1195_v12, %v2138_v18  ;;  %v1230_v39 = vmul.f32 %v1195_v12, %v2141_v48  ;;  %v1190_v0 = vpop.permute.xlu1 %1189 }
 0x707   :  { %v1227_v21 = vmul.f32 %v1190_v0, %v2144_v55  ;;  %v1228_v11 = vmul.f32 %v1190_v0, %v2147_v51 }
 0x708   :  { %v1245_v56 = vadd.f32 %v1229_v32, %v2312_v4  ;;  %v1246_v2 = vadd.f32 %v1230_v39, %v2312_v4 }
 0x709   :  { %v1243_v25 = vadd.f32 %v1227_v21, %v2314_v23  ;;  %v1244_v6 = vadd.f32 %v1228_v11, %v2314_v23  ;;  %v1205_v29 = vpop.permute.xlu0 %1204 }
 0x70a   :  { %1262 = vst [vmem:[#allocation2 + $0x90] sm:$0xff] %v1245_v56  ;;  %1263 = vst [vmem:[#allocation2 + $0x98] sm:$0xff] %v1246_v2  ;;  %v1233_v18 = vmul.f32 %v1205_v29, %v2158_v59  ;;  %v1234_v48 = vmul.f32 %v1205_v29, %v2161_v31  ;;  %v1200_v5 = vpop.permute.xlu1 %1199 }
 0x70b   :  { %1260 = vst [vmem:[#allocation2 + $0x80] sm:$0xff] %v1243_v25  ;;  %1261 = vst [vmem:[#allocation2 + $0x88] sm:$0xff] %v1244_v6  ;;  %v1231_v55 = vmul.f32 %v1200_v5, %v2168_v34  ;;  %v1232_v51 = vmul.f32 %v1200_v5, %v2171_v3 }
 0x70c   :  { %v1249_v4 = vadd.f32 %v1233_v18, %v2324_v13  ;;  %v1250_v30 = vadd.f32 %v1234_v48, %v2324_v13 }
 0x70d   :  { %v1247_v23 = vadd.f32 %v1231_v55, %v2326_v24  ;;  %v1248_v43 = vadd.f32 %v1232_v51, %v2326_v24  ;;  %v1215_v27 = vpop.permute.xlu0 %1214 }
 0x70e   :  { %1266 = vst [vmem:[#allocation2 + $0xb0] sm:$0xff] %v1249_v4  ;;  %1267 = vst [vmem:[#allocation2 + $0xb8] sm:$0xff] %v1250_v30  ;;  %v1237_v59 = vmul.f32 %v1215_v27, %v2188_v33  ;;  %v1238_v31 = vmul.f32 %v1215_v27, %v2191_v28  ;;  %v1210_v52 = vpop.permute.xlu1 %1209 }
 0x70f   :  { %1264 = vst [vmem:[#allocation2 + $0xa0] sm:$0xff] %v1247_v23  ;;  %1265 = vst [vmem:[#allocation2 + $0xa8] sm:$0xff] %v1248_v43  ;;  %v1235_v34 = vmul.f32 %v1210_v52, %v2174_v19  ;;  %v1236_v3 = vmul.f32 %v1210_v52, %v2177_v36  ;;  %v665_v36 = vmul.f32 %v2304_v45, %v2000_v58 }
 0x710   :  { %v1253_v13 = vadd.f32 %v1237_v59, %v2336_v8  ;;  %v1254_v54 = vadd.f32 %v1238_v31, %v2336_v8  ;;  %v666_v8 = vmul.f32 %v2304_v45, %v2003_v41 }
 0x711   :  { %v1251_v24 = vadd.f32 %v1235_v34, %v2338_v40  ;;  %v1252_v47 = vadd.f32 %v1236_v3, %v2338_v40  ;;  %v1225_v33 = vpop.permute.xlu0 %1224 }
 0x712   :  { %1270 = vst [vmem:[#allocation2 + $0xd0] sm:$0xff] %v1253_v13  ;;  %1271 = vst [vmem:[#allocation2 + $0xd8] sm:$0xff] %v1254_v54  ;;  %v1220_v49 = vpop.permute.xlu1 %1219  ;;  %v1241_v40 = vmul.f32 %v1225_v33, %v2208_v9  ;;  %v1242_v10 = vmul.f32 %v1225_v33, %v2211_v63 }
 0x713   :  { %1268 = vst [vmem:[#allocation2 + $0xc0] sm:$0xff] %v1251_v24  ;;  %1269 = vst [vmem:[#allocation2 + $0xc8] sm:$0xff] %v1252_v47  ;;  %v1239_v28 = vmul.f32 %v1220_v49, %v2194_v62  ;;  %v1240_v19 = vmul.f32 %v1220_v49, %v2197_v1 }
 0x715   :  { %v1255_v14 = vadd.f32 %v1239_v28, %v2346_v50  ;;  %v1256_v42 = vadd.f32 %v1240_v19, %v2346_v50 }
 0x716   :  { %v705_v37 = vpop.permute.xlu1 %704 }
 0x717   :  { %1272 = vst [vmem:[#allocation2 + $0xe0] sm:$0xff] %v1255_v14  ;;  %1273 = vst [vmem:[#allocation2 + $0xe8] sm:$0xff] %v1256_v42  ;;  %v721_v62 = vadd.f32 %v705_v37, %v665_v36  ;;  %v722_v1 = vadd.f32 %v705_v37, %v666_v8  ;;  %v1257_v20 = vadd.f32 %v1241_v40, %v705_v37 }
 0x718   :  { %v1258_v22 = vadd.f32 %v1242_v10, %v705_v37 }
 0x719   :  { %737 = vst [vmem:[#allocation2 + $0x70] sm:$0xff] %v721_v62  ;;  %738 = vst [vmem:[#allocation2 + $0x78] sm:$0xff] %v722_v1 }
 0x71a   :  { %1274 = vst [vmem:[#allocation2 + $0xf0] sm:$0xff] %v1257_v20  ;;  %1275 = vst [vmem:[#allocation2 + $0xf8] sm:$0xff] %v1258_v22 }
 0x71b   :  { %1649 = shalt.err (!%p1646_p4)
}
 0x71c   :  { %s1650_s23 = scalar_lea.hbm %s2413_s6, 4096 }
 0x71d   :  { %p1651_p5 = scmp.ne.s32.totalorder %s2413_s6, %s1650_s23  ;;  %p1654_p6 = scmp.lt.u32.totalorder %s1650_s23, %s2413_s6 }
 0x71f   :  { %p1656_p7 = pnand %p1654_p6, %p1651_p5 }
 0x721   :  { %1659 = shalt.err (!%p1656_p7)
}
 0x722   :  { %s1664_s1 = smov 256   ;;  %s1665_s2 = smov 16  }
 0x723   :  { %1287 = dma.vmem_to_hbm [thread:$0]  %s1282_s19, 4096, %s2413_s6, [#allocation3], %s1664_s1, %s1664_s1, %s1665_s2  }
 0x724   :  { %1660 = dma.done.wait [#allocation3], 4096  }
 0x725   :  { %1661 = vsyncadd [#allocation3], 4294963200 }
 0x726   :  { %1291 = vsyncpa [#allocation3], 1 }

</bundles_post_ra>
